<compile_context>
chip_gen: v7x
topology: tpu7x:2x2x1
jax: 0.10.0
libtpu: 0.0.40
codegen_flags: <defaults>
</compile_context>

<pallas_src>
import functools

import jax
import jax.numpy as jnp
from jax.experimental import pallas as pl
from jax.experimental.pallas import tpu as pltpu


def _fused_block_kernel(x_ref, w1_ref, t1_ref, w2_ref, t2_ref, o_ref):
    # x_ref:  (C_in, TM)    -- batch dim squeezed; channels on sublanes,
    #                          spatial on lanes
    # w1_ref: (C_out, C_in)  (BN scale folded in)
    # t1_ref: (C_out, 1)
    # w2_ref: (C_out, C_out) (BN scale folded in)
    # t2_ref: (C_out, 1)
    # o_ref:  (C_out, TM)   -- lane-dense output store
    x = x_ref[...]

    # conv1 (1x1) + folded BN + ReLU
    h = jnp.dot(w1_ref[...], x, preferred_element_type=jnp.float32)
    h = jnp.maximum(h + t1_ref[...], 0.0)                         # (C_out, TM)

    # conv2 (1x1) + folded BN + ReLU
    y = jnp.dot(w2_ref[...], h, preferred_element_type=jnp.float32)
    y = jnp.maximum(y + t2_ref[...], 0.0)                         # (C_out, TM)

    o_ref[...] = y.astype(o_ref.dtype)


def _choose_tm(hw, n, c_in, c_out, tile_m):
    """Pick the spatial (lane) tile size.

    Constraints:
      * tm is a multiple of 128, or tm == hw (full array extent).
      * per-step VMEM ~= [2*(c_in+c_out) + 2*c_out] * 4 * tm bytes must stay
        well inside v5e's 16 MiB scoped default (smallest of the three gens).
      * total grid steps n * cdiv(hw, tm) >= 4 whenever hw allows it, so both
        v7x TensorCores get work and each still pipelines.
      * prefer a tm that divides hw so every store stays lane-dense.
    """
    if hw <= 128:
        return hw                                   # single full-extent tile

    bytes_per_lane = 4 * (2 * (c_in + c_out) + 2 * c_out)
    vmem_budget = 10 * 1024 * 1024                  # conservative (< 16 MiB)
    tm = min(tile_m, max(128, vmem_budget // bytes_per_lane), hw)

    # Megacore: want >= 4 total grid steps when the spatial extent allows it.
    min_steps = 4
    if n < min_steps:
        need_spatial = -(-min_steps // n)           # ceil(min_steps / n)
        tm = min(tm, max(128, hw // need_spatial))

    tm = max(128, (tm // 128) * 128)
    if tm >= hw:
        return hw

    # Prefer a divisor of hw (keeps every store lane-dense, no masked tail).
    if hw % 128 == 0 and hw % tm != 0:
        units = hw // 128
        best = 1
        for d in range(1, units + 1):
            if units % d == 0 and d * 128 <= tm:
                best = d
        tm = best * 128
    return tm


def conv_block_1_pallas(x_nchw, params, *, tile_m=32768, eps=1e-5):
    """Fused conv_block_1 forward. x_nchw: (N, C_in, H, W) float32 -> NCHW out."""
    (w1, b1, g1, beta1, rm1, rv1,
     w2, b2, g2, beta2, rm2, rv2) = params

    n, c_in, h, w = x_nchw.shape
    c_out = w1.shape[0]
    hw = h * w

    # ---- glue: BN folding into weights/shifts (tiny one-time XLA ops) ----
    s1 = g1 / jnp.sqrt(rv1 + eps)
    t1 = (b1 - rm1) * s1 + beta1
    s2 = g2 / jnp.sqrt(rv2 + eps)
    t2 = (b2 - rm2) * s2 + beta2

    w1_f = w1 * s1[:, None]                    # (C_out, C_in)
    w2_f = w2 * s2[:, None]                    # (C_out, C_out)
    t1c = t1.reshape(c_out, 1)
    t2c = t2.reshape(c_out, 1)

    # channels-on-sublanes, spatial-on-lanes layout: no transpose, no pad.
    x_flat = x_nchw.reshape(n, c_in, hw)

    tm = _choose_tm(hw, n, c_in, c_out, tile_m)
    grid = (n, pl.cdiv(hw, tm))

    # Advisory cost hint for XLA's scheduler (mem-bound custom call).
    flops = 2 * n * hw * c_out * (c_in + c_out)
    bytes_accessed = 4 * n * hw * (c_in + c_out) \
        + 4 * (c_out * c_in + c_out * c_out + 2 * c_out)
    cost = pl.CostEstimate(flops=flops, transcendentals=0,
                           bytes_accessed=bytes_accessed)

    out_flat = pl.pallas_call(
        _fused_block_kernel,
        out_shape=jax.ShapeDtypeStruct((n, c_out, hw), jnp.float32),
        grid_spec=pltpu.PrefetchScalarGridSpec(
            num_scalar_prefetch=0,
            grid=grid,
            in_specs=[
                # x tile: batch dim squeezed, (c_in, tm) in the kernel
                pl.BlockSpec((pl.Squeezed(), c_in, tm), lambda b, i: (b, 0, i)),
                # grid-invariant weights/shifts (tiny at these channel counts;
                # double-buffered by default -> ~2x their size in VMEM, which
                # is already included in the budget above)
                pl.BlockSpec((c_out, c_in), lambda b, i: (0, 0)),      # W1*s1
                pl.BlockSpec((c_out, 1), lambda b, i: (0, 0)),         # t1
                pl.BlockSpec((c_out, c_out), lambda b, i: (0, 0)),     # W2*s2
                pl.BlockSpec((c_out, 1), lambda b, i: (0, 0)),         # t2
            ],
            out_specs=pl.BlockSpec((pl.Squeezed(), c_out, tm),
                                   lambda b, i: (b, 0, i)),
        ),
        compiler_params=pltpu.CompilerParams(
            # "parallel" only matters on v7x (two TCs); harmless elsewhere.
            dimension_semantics=("parallel", "parallel")),
        cost_estimate=cost,
    )(x_flat, w1_f, t1c, w2_f, t2c)

    return out_flat.reshape(n, c_out, h, w)    # already NCHW; no transpose


def _reference(x_nchw, params, eps=1e-5):
    """Pure-JAX reference of the same forward (eval-mode BN)."""
    (w1, b1, g1, beta1, rm1, rv1,
     w2, b2, g2, beta2, rm2, rv2) = params
    x = jnp.transpose(x_nchw, (0, 2, 3, 1))                      # NHWC
    z = jnp.einsum('nhwc,oc->nhwo', x, w1) + b1
    z = (z - rm1) / jnp.sqrt(rv1 + eps) * g1 + beta1
    z = jnp.maximum(z, 0.0)
    y = jnp.einsum('nhwc,oc->nhwo', z, w2) + b2
    y = (y - rm2) / jnp.sqrt(rv2 + eps) * g2 + beta2
    y = jnp.maximum(y, 0.0)
    return jnp.transpose(y, (0, 3, 1, 2))                        # NCHW


def init_params(key, ch_in, ch_out):
    """Deterministic synthetic parameter init (shapes match the nn.Module)."""
    ks = jax.random.split(key, 8)
    w1 = jax.random.normal(ks[0], (ch_out, ch_in), jnp.float32) * 0.3
    b1 = jax.random.normal(ks[1], (ch_out,), jnp.float32) * 0.1
    g1 = 1.0 + 0.1 * jax.random.normal(ks[2], (ch_out,), jnp.float32)
    beta1 = 0.1 * jax.random.normal(ks[3], (ch_out,), jnp.float32)
    rm1 = 0.05 * jax.random.normal(ks[4], (ch_out,), jnp.float32)
    rv1 = 1.0 + 0.1 * jnp.abs(jax.random.normal(ks[5], (ch_out,), jnp.float32))

    w2 = jax.random.normal(ks[6], (ch_out, ch_out), jnp.float32) * 0.3
    b2 = jax.random.normal(ks[7], (ch_out,), jnp.float32) * 0.1
    g2 = jnp.ones((ch_out,), jnp.float32)
    beta2 = jnp.zeros((ch_out,), jnp.float32)
    rm2 = jnp.zeros((ch_out,), jnp.float32)
    rv2 = jnp.ones((ch_out,), jnp.float32)
    return (w1, b1, g1, beta1, rm1, rv1, w2, b2, g2, beta2, rm2, rv2)


if __name__ == "__main__":
    key = jax.random.PRNGKey(0)
    k_x, k_p = jax.random.split(key)

    N, C_IN, C_OUT, H, W = 2, 4, 8, 16, 16
    x = jax.random.normal(k_x, (N, C_IN, H, W), jnp.float32)
    params = init_params(k_p, C_IN, C_OUT)

    run = jax.jit(functools.partial(conv_block_1_pallas, tile_m=32768))
    out = run(x, params)
    out = jax.block_until_ready(out)

    ref = _reference(x, params)
    assert out.shape == (N, C_OUT, H, W)
    assert jnp.allclose(out, ref, atol=1e-4, rtol=1e-4), "mismatch vs reference"

    print("KERNEL_OK")
</pallas_src>

<mosaic_0001>
module attributes {stable_mosaic.version = 11 : i64} {
  func.func @_fused_block_kernel(%arg0: i32, %arg1: i32, %arg2: memref<1x4x128xf32, #tpu.memory_space<vmem>>, %arg3: memref<8x4xf32, #tpu.memory_space<vmem>>, %arg4: memref<8x1xf32, #tpu.memory_space<vmem>>, %arg5: memref<8x8xf32, #tpu.memory_space<vmem>>, %arg6: memref<8x1xf32, #tpu.memory_space<vmem>>, %arg7: memref<1x8x128xf32, #tpu.memory_space<vmem>>) attributes {dimension_semantics = [#tpu.dimension_semantics<parallel>, #tpu.dimension_semantics<parallel>], iteration_bounds = array<i64: 2, 2>, scalar_prefetch = 0 : i64, scratch_operands = 0 : i64, tpu.core_type = #tpu.core_type<tc>, window_params = [{transform_indices = @transform_0, window_bounds = array<i64: 1, 4, 128>}, {pipeline_mode = #tpu.pipeline_mode<synchronous>, transform_indices = @transform_1, window_bounds = array<i64: 8, 4>}, {pipeline_mode = #tpu.pipeline_mode<synchronous>, transform_indices = @transform_2, window_bounds = array<i64: 8, 1>}, {pipeline_mode = #tpu.pipeline_mode<synchronous>, transform_indices = @transform_3, window_bounds = array<i64: 8, 8>}, {pipeline_mode = #tpu.pipeline_mode<synchronous>, transform_indices = @transform_4, window_bounds = array<i64: 8, 1>}, {transform_indices = @transform_5, window_bounds = array<i64: 1, 8, 128>}]} {
    %c0 = arith.constant 0 : index
    %c0_0 = arith.constant 0 : index
    %c0_1 = arith.constant 0 : index
    %0 = vector.load %arg2[%c0, %c0_0, %c0_1] : memref<1x4x128xf32, #tpu.memory_space<vmem>>, vector<1x4x128xf32>
    %1 = vector.shape_cast %0 : vector<1x4x128xf32> to vector<4x128xf32>
    %c0_2 = arith.constant 0 : index
    %c0_3 = arith.constant 0 : index
    %2 = vector.load %arg3[%c0_2, %c0_3] : memref<8x4xf32, #tpu.memory_space<vmem>>, vector<8x4xf32>
    %cst = arith.constant dense<0.000000e+00> : vector<8x128xf32>
    %3 = tpu.matmul %2, %1, %cst {dimension_numbers = #tpu.dot_dimension_numbers<[1], [0], [0], [1], [0, 0, 1, 1], [], []>} : vector<8x4xf32>, vector<4x128xf32>, vector<8x128xf32> -> vector<8x128xf32>
    %c0_4 = arith.constant 0 : index
    %c0_5 = arith.constant 0 : index
    %4 = vector.load %arg4[%c0_4, %c0_5] : memref<8x1xf32, #tpu.memory_space<vmem>>, vector<8x1xf32>
    %5 = vector.broadcast %4 : vector<8x1xf32> to vector<8x128xf32>
    %6 = arith.addf %3, %5 : vector<8x128xf32>
    %cst_6 = arith.constant 0.000000e+00 : f32
    %7 = vector.broadcast %cst_6 : f32 to vector<8x128xf32>
    %8 = arith.maximumf %6, %7 : vector<8x128xf32>
    %c0_7 = arith.constant 0 : index
    %c0_8 = arith.constant 0 : index
    %9 = vector.load %arg5[%c0_7, %c0_8] : memref<8x8xf32, #tpu.memory_space<vmem>>, vector<8x8xf32>
    %cst_9 = arith.constant dense<0.000000e+00> : vector<8x128xf32>
    %10 = tpu.matmul %9, %8, %cst_9 {dimension_numbers = #tpu.dot_dimension_numbers<[1], [0], [0], [1], [0, 0, 1, 1], [], []>} : vector<8x8xf32>, vector<8x128xf32>, vector<8x128xf32> -> vector<8x128xf32>
    %c0_10 = arith.constant 0 : index
    %c0_11 = arith.constant 0 : index
    %11 = vector.load %arg6[%c0_10, %c0_11] : memref<8x1xf32, #tpu.memory_space<vmem>>, vector<8x1xf32>
    %12 = vector.broadcast %11 : vector<8x1xf32> to vector<8x128xf32>
    %13 = arith.addf %10, %12 : vector<8x128xf32>
    %cst_12 = arith.constant 0.000000e+00 : f32
    %14 = vector.broadcast %cst_12 : f32 to vector<8x128xf32>
    %15 = arith.maximumf %13, %14 : vector<8x128xf32>
    %c0_13 = arith.constant 0 : index
    %c0_14 = arith.constant 0 : index
    %c0_15 = arith.constant 0 : index
    %16 = vector.load %arg7[%c0_13, %c0_14, %c0_15] : memref<1x8x128xf32, #tpu.memory_space<vmem>>, vector<1x8x128xf32>
    %17 = vector.shape_cast %16 : vector<1x8x128xf32> to vector<8x128xf32>
    %18 = vector.shape_cast %15 : vector<8x128xf32> to vector<1x8x128xf32>
    tpu.vector_store %arg7[%c0_13, %c0_14, %c0_15], %18 {strides = array<i32>} : memref<1x8x128xf32, #tpu.memory_space<vmem>>, vector<1x8x128xf32>,
    return
  }
  func.func @transform_0(%arg0: i32, %arg1: i32) -> (i32, i32, i32) {
    %c0_i32 = arith.constant 0 : i32
    %c0_i32_0 = arith.constant 0 : i32
    return %arg0, %c0_i32, %arg1 : i32, i32, i32
  }
  func.func @transform_1(%arg0: i32, %arg1: i32) -> (i32, i32) {
    %c0_i32 = arith.constant 0 : i32
    %c0_i32_0 = arith.constant 0 : i32
    %c0_i32_1 = arith.constant 0 : i32
    return %c0_i32, %c0_i32_0 : i32, i32
  }
  func.func @transform_2(%arg0: i32, %arg1: i32) -> (i32, i32) {
    %c0_i32 = arith.constant 0 : i32
    %c0_i32_0 = arith.constant 0 : i32
    %c0_i32_1 = arith.constant 0 : i32
    return %c0_i32, %c0_i32_0 : i32, i32
  }
  func.func @transform_3(%arg0: i32, %arg1: i32) -> (i32, i32) {
    %c0_i32 = arith.constant 0 : i32
    %c0_i32_0 = arith.constant 0 : i32
    %c0_i32_1 = arith.constant 0 : i32
    return %c0_i32, %c0_i32_0 : i32, i32
  }
  func.func @transform_4(%arg0: i32, %arg1: i32) -> (i32, i32) {
    %c0_i32 = arith.constant 0 : i32
    %c0_i32_0 = arith.constant 0 : i32
    %c0_i32_1 = arith.constant 0 : i32
    return %c0_i32, %c0_i32_0 : i32, i32
  }
  func.func @transform_5(%arg0: i32, %arg1: i32) -> (i32, i32, i32) {
    %c0_i32 = arith.constant 0 : i32
    %c0_i32_0 = arith.constant 0 : i32
    return %arg0, %c0_i32, %arg1 : i32, i32, i32
  }
}

</mosaic_0001>

<bundles_post_ra>
// kernel: conv_block_1_pallas.1
= control target key start
LH: loop header
LB: loop body
LE: loop exit
PB: predicated region body
PF: predicated region fallthrough
CT: control target
= control target key end

     0   :  { %s657_s18 = smov 0   ;;  %s659_s19 = smov 0   ;;  %s720_s0 = inlined_call_operand.vmem [shape: f32[2,4,256], index: 0, kind: input, shape index: {}]   ;;  %s721_s1 = inlined_call_operand.vmem [shape: f32[8,4], index: 1, kind: input, shape index: {}]   ;;  %s722_s2 = inlined_call_operand.vmem [shape: f32[8,1], index: 2, kind: input, shape index: {}]   ;;  %s723_s3 = inlined_call_operand.vmem [shape: f32[8,8], index: 3, kind: input, shape index: {}]   ;;  %s724_s4 = inlined_call_operand.vmem [shape: f32[8,1], index: 4, kind: input, shape index: {}]   ;;  %s725_s5 = inlined_call_operand.vmem [shape: f32[2,8,256], index: 5, kind: output, shape index: {}]  }
   0x1   :  { %s661_s20 = smov 0   ;;  %s663_s21 = smov 0  }
   0x2   :  { %s665_s22 = smov 0  }
   0x3 LB: > { %s24_s23 = sadd.s32 1, %s614_s20  ;;  %s27_s24 = sadd.s32 1, %s618_s21  ;;  %s622_s22 = sphi %s665_s22, %s15_s22   ;;  %s618_s21 = sphi %s663_s21, %s729_s21   ;;  %s614_s20 = sphi %s661_s20, %s728_s20   ;;  %s610_s19 = sphi %s659_s19, %s727_s19   ;;  %s606_s18 = sphi %s657_s18, %s726_s18  }
   0x4   : > { %p25_p0 = scmp.ge.s32.totalorder %s24_s23, 2  ;;  %p516_p1 = scmp.ge.s32.totalorder %s622_s22, 1 }
   0x5   : > { %p206_p2 = scmp.lt.s32.totalorder %s622_s22, 5 }
   0x6   : > { %s731_s23 = smov (%p25_p0, %s24_s23), 0  ;;  %s733_s24 = smov (!%p25_p0, %s27_s24), %s618_s21 }
   0x7   : > { %p207_p3 = pnand %p516_p1, %p206_p2  ;;  %p29_p4 = scmp.ge.s32.totalorder %s733_s24, 2 }
   0x8   : > { %p240_p5 = scmp.lt.s32.totalorder (!%p207_p3), %s610_s19, 1  ;;  %p242_p6 = scmp.lt.s32.totalorder (!%p207_p3), %s606_s18, 1  ;;  %v624_v0 = vmov (!%p207_p3), 0.0   ;;  %vm625_vm0 = vmmov (!%p207_p3), 0   ;;  %v258_v1 = vld [vmem:[%s722_s2] sm:$0xff] (!%p207_p3)  ;;  %v626_v2 = vmov (!%p207_p3), 0  }
   0x9   : > { %s735_s24 = smov (%p29_p4, %s733_s24), 0  ;;  %210 = sbr.rel (%p207_p3) target bundleno = 457 (0x1c9), region = 40 }
   0xa   : > { %530 = vmatprep.subr.mxu0 (!%p207_p3), %v624_v0  ;;  %532 = vmatprep.mubr.msk.f32.mxu0 (!%p207_p3), %vm625_vm0, %v624_v0  ;;  %v344_v3 = vld [vmem:[%s724_s4] sm:$0xff] (!%p207_p3)  ;;  %vm268_vm1 = vcmask (!%p207_p3), 1043456   ;;  %vm264_vm2 = vcmask (!%p207_p3), 31744   ;;  %vm350_vm3 = vcmask (!%p207_p3), 64512  }
   0xb   : > { %583 = vset.pattern.permute.xlu0 (!%p207_p3), %v626_v2  ;;  %535 = vmatprep.subr.mxu1 (!%p207_p3), %v624_v0  ;;  %v257_v4 = vld [vmem:[%s721_s1] sm:$0xff] (!%p207_p3) }
   0xc   : > { %261 = vperm.xlu0 (!%p207_p3), %583, %v258_v1   ;;  %537 = vmatprep.mubr.msk.f32.mxu1 (!%p207_p3), %vm625_vm0, %v624_v0  ;;  %v343_v11 = vld [vmem:[%s723_s3] sm:$0xff] (!%p207_p3) }
  0x10   : > { %s737_s19 = smov (!%p240_p5, %s610_s19), 1  ;;  %s739_s18 = smov (!%p242_p6, %s606_s18), 1  ;;  %347 = vperm.xlu0 %583, %v344_v3  }
  0x11   : > { %s517_s27 = sshll.u32 %s737_s19, 1 }
  0x12   : > { %s245_s30 = sadd.s32 %s517_s27, %s739_s18 }
  0x13   : > { %s518_s6 = sshll.u32 %s245_s30, 2  ;;  %s520_s14 = sshll.u32 %s245_s30, 3 }
  0x14   : > { %s247_s9 = scalar_lea.vmem %s720_s0, %s518_s6  ;;  %s255_s17 = scalar_lea.vmem %s725_s5, %s520_s14 }
  0x15   : > { %v256_v5 = vld [vmem:[%s247_s9] sm:$0xf] }
  0x16   : > { %531 = vmatpush3.msk.msra.mxu0 %vm268_vm1, %v256_v5 }
  0x17   : > { %533 = vmatmul.mubr.msk.f32.vlgmr.msra.gmra.mrb[0].mxu0 %vm264_vm2, %v257_v4 }
  0x8b   : > { %v262_v6 = vpop.permute.xlu0 %261 }
  0x8f   : > { %v348_v12 = vpop.permute.xlu0 %347 }
  0xea   : > { %v338_v7 = vpop.f32.mrb[0].mxu0 }
  0xeb   : > { %v339_v8 = vadd.f32 %v338_v7, %v262_v6  ;;  %v534_v9 = vpop.f32.mrb[1].mxu0 }
  0xed   : > { %v342_v10 = vmax.f32 %v339_v8, 0.0 }
  0xef   : > { %536 = vmatpush3.msra.mxu1 %v342_v10 }
  0xf0   : > { %538 = vmatmul.mubr.msk.f32.vlgmr.msra.gmra.mrb[0].mxu1 %vm350_vm3, %v343_v11 }
 0x1c3   : > { %v420_v13 = vpop.f32.mrb[0].mxu1 }
 0x1c4   : > { %v421_v14 = vadd.f32 %v420_v13, %v348_v12  ;;  %v539_v15 = vpop.f32.mrb[1].mxu1 }
 0x1c6   : > { %v424_v16 = vmax.f32 %v421_v14, 0.0 }
 0x1c8   : > { %425 = vst [vmem:[%s255_s17] sm:$0xff] %v424_v16 }
 0x1c9 PF: > { %s15_s22 = sadd.s32 1, %s622_s22   ;;  %s726_s18 = smov %s614_s20 }
 0x1ca   : > { %p12_p7 = scmp.ge.s32.totalorder %s15_s22, 6   ;;  %s727_s19 = smov %s618_s21 }
 0x1cb   : > { %s728_s20 = smov %s731_s23  ;;  %s729_s21 = smov %s735_s24 }
 0x1cc   :  { %14 = sbr.rel (!%p12_p7) target bundleno = 3 (0x3), region = 70 }

</bundles_post_ra>
